<compile_context>
chip_gen: v7x
topology: tpu7x:2x2x1
jax: 0.10.0
libtpu: 0.0.40
codegen_flags: <defaults>
</compile_context>

<pallas_src>
import jax
import jax.numpy as jnp
from jax.experimental import pallas as pl
from jax.experimental.pallas import tpu as pltpu


# ----------------------------- small helpers --------------------------------

def _round_up(x: int, m: int) -> int:
    return -(-x // m) * m


def _divisors_desc(n: int):
    return [d for d in range(n, 0, -1) if n % d == 0]


def _sublane_quantum(itemsize: int) -> int:
    # dtype-dependent sublane packing: 8 rows for 4-byte, 16 for 2-byte, 32 for 1-byte.
    return {4: 8, 2: 16, 1: 32}.get(itemsize, 8)


def _vmem_capacity_bytes() -> int:
    """Generation-aware VMEM size (v5e/v6e: 128 MiB, v7x: 64 MiB per TC)."""
    try:
        cap = int(getattr(pltpu.get_tpu_info(), "vmem_capacity_bytes", 0))
        if cap > 0:
            return cap
    except Exception:
        pass
    return 64 << 20  # conservative fallback, safe on every generation


def _num_tensorcores() -> int:
    """TensorCores a single Pallas grid can be sharded across (megacore)."""
    try:
        kind = jax.devices()[0].device_kind.lower()
    except Exception:
        return 1
    if "v7" in kind or "7x" in kind or "v4" in kind:
        return 2
    return 1


def _split_hw(hw: int, itemsize: int):
    """Split H*W into (nH, hwt): hwt lane-dense (multiple of 128), minimal
    sublane padding. Returns None when no lane-dense split exists."""
    s = _sublane_quantum(itemsize)
    candidates = [t for t in range(128, hw + 1, 128) if hw % t == 0]
    if not candidates:
        return None

    def padded_plane(t):  # padded elements per channel plane for this split
        return _round_up(hw // t, s) * t

    best = min(candidates, key=lambda t: (padded_plane(t), t))
    return hw // best, best


def _choose_tiles(cpg, groups, nH, hwt, itemsize, batch, vmem_cap, num_tc):
    """Pick (channels-per-group tile, row tile) and the padded block bytes."""
    s = _sublane_quantum(itemsize)
    hwtp = _round_up(hwt, 128)

    def blk_bytes(ct_, nh_):
        return groups * ct_ * _round_up(nh_, s) * hwtp * itemsize

    # Per-buffer cap; in+out double-buffered ~ 4x this. Generation aware:
    # ~6.4 MiB on v7x (64 MiB VMEM), 8 MiB on v5e/v6e (128 MiB VMEM).
    cap = min(8 << 20, vmem_cap // 10)

    # Largest channels-per-group tile (divisor of cpg) that fits the cap.
    ct = 1
    for d in _divisors_desc(cpg):
        if blk_bytes(d, nH) <= cap:
            ct = d
            break

    # If even one channel per group over-fills the cap, split the rows too
    # (row tile must stay sublane-quantum aligned or cover nH fully).
    nh_t = nH
    if blk_bytes(ct, nH) > cap:
        aligned = [d for d in _divisors_desc(nH) if d % s == 0]
        chosen = next((d for d in aligned if blk_bytes(ct, d) <= cap), None)
        if chosen is None and aligned:
            chosen = aligned[-1]
        if chosen is not None:
            nh_t = chosen

    # Multi-TC chips: expose >= 2 independent grid steps per core. Prefer a
    # row-tile split (handles odd ct) before shrinking the channel tile.
    if num_tc > 1:
        min_steps = 2 * num_tc

        def steps(ct_, nh_):
            return batch * (cpg // ct_) * (nH // nh_)

        if steps(ct, nh_t) < min_steps:
            done = False
            for d in _divisors_desc(nh_t):
                if (d == nH or d % s == 0) and steps(ct, d) >= min_steps:
                    nh_t, done = d, True
                    break
            if not done:
                for d in _divisors_desc(ct):
                    if steps(d, nh_t) >= min_steps:
                        ct = d
                        break

    return ct, nh_t, blk_bytes(ct, nh_t)


# ------------------------------- the kernel ---------------------------------

def _make_shuffle_kernel(groups: int, ct: int):
    """Permute the two leading channel axes of the block.

    x_ref: (1, groups, ct, nh_t, hwt)   input  viewed as (B, groups, cpg, nH, hwt)
    o_ref: (1, ct, groups, nh_t, hwt)   output viewed as (B, cpg, groups, nH, hwt)

    Only major dims are indexed, so every statement is a whole-(nh_t, hwt)-tile
    VMEM copy; the loop is a static unroll over the smaller channel axis.
    """
    if groups <= ct:
        def kernel(x_ref, o_ref):
            for g in range(groups):
                o_ref[0, :, g, :, :] = x_ref[0, g, :, :, :]
    else:
        def kernel(x_ref, o_ref):
            for c in range(ct):
                o_ref[0, c, :, :, :] = x_ref[0, :, c, :, :]
    return kernel


def channel_shuffle_ref(x: jax.Array, groups: int) -> jax.Array:
    """Pure-JAX reference (mirrors the PyTorch view/transpose/view)."""
    B, C, H, W = x.shape
    cpg = C // groups
    y = x.reshape(B, groups, cpg, H, W)
    y = jnp.swapaxes(y, 1, 2)
    return y.reshape(B, C, H, W)


def channel_shuffle(x: jax.Array, groups: int) -> jax.Array:
    """Pallas TPU implementation of ChannelShuffle(groups).forward(x), NCHW."""
    B, C, H, W = x.shape
    if C % groups != 0:
        raise ValueError("num_channels must be divisible by groups")
    cpg = C // groups
    if groups == 1 or cpg == 1:
        return x  # the permutation is the identity

    HW = H * W
    itemsize = jnp.dtype(x.dtype).itemsize

    split = _split_hw(HW, itemsize)
    if split is None:
        # H*W not a multiple of 128: every store would be a masked vst.msk on a
        # <128-lane tile; XLA's native reshape/swapaxes copy wins there.
        return channel_shuffle_ref(x, groups)
    nH, hwt = split

    vmem_cap = _vmem_capacity_bytes()
    num_tc = _num_tensorcores()
    ct, nh_t, blk = _choose_tiles(cpg, groups, nH, hwt, itemsize, B, vmem_cap, num_tc)

    hard_cap = vmem_cap - (16 << 20)      # leave headroom for Mosaic internals
    need = 4 * blk + (2 << 20)            # in+out, double-buffered, + slack
    if need > hard_cap:
        # Block cannot be double-buffered inside VMEM on this chip: delegate.
        return channel_shuffle_ref(x, groups)
    vmem_limit = int(min(hard_cap, max(need, 32 << 20)))

    n_ct = cpg // ct
    n_nh = nH // nh_t

    # Free (metadata-only) view: NCHW is contiguous in (groups, cpg, H*W).
    x5 = x.reshape(B, groups, cpg, nH, hwt)

    # Input block:  all groups x one channel tile x one row tile (strided reads,
    #               each run contiguous in HBM).
    # Output block: contiguous slab of the output viewed as (B, cpg, groups, HW);
    #               reshaping back to (B, C, H, W) yields channel c*groups + g,
    #               i.e. exactly the shuffle.
    in_spec = pl.BlockSpec((1, groups, ct, nh_t, hwt), lambda b, i, h: (b, 0, i, h, 0))
    out_spec = pl.BlockSpec((1, ct, groups, nh_t, hwt), lambda b, i, h: (b, i, 0, h, 0))

    out5 = pl.pallas_call(
        _make_shuffle_kernel(groups, ct),
        out_shape=jax.ShapeDtypeStruct((B, cpg, groups, nH, hwt), x.dtype),
        grid_spec=pltpu.PrefetchScalarGridSpec(
            num_scalar_prefetch=0,
            grid=(B, n_ct, n_nh),
            in_specs=[in_spec],
            out_specs=out_spec,
        ),
        compiler_params=pltpu.CompilerParams(
            dimension_semantics=("parallel", "parallel", "parallel"),
            vmem_limit_bytes=vmem_limit,
        ),
        cost_estimate=pl.CostEstimate(
            flops=0, transcendentals=0,
            bytes_accessed=2 * B * C * H * W * itemsize),
    )(x5)

    return out5.reshape(B, C, H, W)


# --------------------------------- smoke test --------------------------------

if __name__ == "__main__":
    key = jax.random.PRNGKey(0)

    # (B, C, H, W, groups, dtype) — small shapes; first one matches the module spec.
    configs = [
        (2, 4, 16, 16, 2, jnp.float32),    # the reference shape
        (2, 12, 8, 32, 3, jnp.float32),    # non-power-of-two groups
        (1, 32, 16, 16, 2, jnp.float32),   # larger cpg, loop-over-groups branch
        (1, 16, 32, 32, 4, jnp.float32),   # HW=1024: zero-sublane-padding split
        (2, 8, 16, 32, 4, jnp.bfloat16),   # bf16 (sublane quantum 16)
    ]

    for idx, (B, C, H, W, groups, dtype) in enumerate(configs):
        k = jax.random.fold_in(key, idx)
        x = jax.random.normal(k, (B, C, H, W), dtype=jnp.float32).astype(dtype)

        out = jax.block_until_ready(channel_shuffle(x, groups))
        ref = channel_shuffle_ref(x, groups)

        assert out.shape == ref.shape and out.dtype == ref.dtype
        assert jnp.array_equal(out, ref), f"channel shuffle mismatch for {(B, C, H, W, groups, dtype)}"

    print("KERNEL_OK")
</pallas_src>

<mosaic_0001>
module attributes {stable_mosaic.version = 11 : i64} {
  func.func @kernel(%arg0: i32, %arg1: i32, %arg2: i32, %arg3: memref<1x2x2x2x128xf32, #tpu.memory_space<vmem>>, %arg4: memref<1x2x2x2x128xf32, #tpu.memory_space<vmem>>) attributes {dimension_semantics = [#tpu.dimension_semantics<parallel>, #tpu.dimension_semantics<parallel>, #tpu.dimension_semantics<parallel>], iteration_bounds = array<i64: 2, 1, 1>, scalar_prefetch = 0 : i64, scratch_operands = 0 : i64, tpu.core_type = #tpu.core_type<tc>, window_params = [{transform_indices = @transform_0, window_bounds = array<i64: 1, 2, 2, 2, 128>}, {transform_indices = @transform_1, window_bounds = array<i64: 1, 2, 2, 2, 128>}]} {
    %c0 = arith.constant 0 : index
    %c0_0 = arith.constant 0 : index
    %c0_1 = arith.constant 0 : index
    %c0_2 = arith.constant 0 : index
    %c0_3 = arith.constant 0 : index
    %0 = vector.load %arg3[%c0, %c0_0, %c0_1, %c0_2, %c0_3] : memref<1x2x2x2x128xf32, #tpu.memory_space<vmem>>, vector<1x1x2x2x128xf32>
    %1 = vector.shape_cast %0 : vector<1x1x2x2x128xf32> to vector<2x2x128xf32>
    %c0_4 = arith.constant 0 : index
    %c0_5 = arith.constant 0 : index
    %c0_6 = arith.constant 0 : index
    %c0_7 = arith.constant 0 : index
    %c0_8 = arith.constant 0 : index
    %2 = vector.load %arg4[%c0_4, %c0_5, %c0_6, %c0_7, %c0_8] : memref<1x2x2x2x128xf32, #tpu.memory_space<vmem>>, vector<1x2x1x2x128xf32>
    %3 = vector.shape_cast %2 : vector<1x2x1x2x128xf32> to vector<2x2x128xf32>
    %4 = vector.shape_cast %1 : vector<2x2x128xf32> to vector<1x2x1x2x128xf32>
    tpu.vector_store %arg4[%c0_4, %c0_5, %c0_6, %c0_7, %c0_8], %4 {strides = array<i32>} : memref<1x2x2x2x128xf32, #tpu.memory_space<vmem>>, vector<1x2x1x2x128xf32>,
    %c0_9 = arith.constant 0 : index
    %c1 = arith.constant 1 : index
    %c0_10 = arith.constant 0 : index
    %c0_11 = arith.constant 0 : index
    %c0_12 = arith.constant 0 : index
    %5 = vector.load %arg3[%c0_9, %c1, %c0_10, %c0_11, %c0_12] : memref<1x2x2x2x128xf32, #tpu.memory_space<vmem>>, vector<1x1x2x2x128xf32>
    %6 = vector.shape_cast %5 : vector<1x1x2x2x128xf32> to vector<2x2x128xf32>
    %c0_13 = arith.constant 0 : index
    %c0_14 = arith.constant 0 : index
    %c1_15 = arith.constant 1 : index
    %c0_16 = arith.constant 0 : index
    %c0_17 = arith.constant 0 : index
    %7 = vector.load %arg4[%c0_13, %c0_14, %c1_15, %c0_16, %c0_17] : memref<1x2x2x2x128xf32, #tpu.memory_space<vmem>>, vector<1x2x1x2x128xf32>
    %8 = vector.shape_cast %7 : vector<1x2x1x2x128xf32> to vector<2x2x128xf32>
    %9 = vector.shape_cast %6 : vector<2x2x128xf32> to vector<1x2x1x2x128xf32>
    tpu.vector_store %arg4[%c0_13, %c0_14, %c1_15, %c0_16, %c0_17], %9 {strides = array<i32>} : memref<1x2x2x2x128xf32, #tpu.memory_space<vmem>>, vector<1x2x1x2x128xf32>,
    return
  }
  func.func @transform_0(%arg0: i32, %arg1: i32, %arg2: i32) -> (i32, i32, i32, i32, i32) {
    %c0_i32 = arith.constant 0 : i32
    %c0_i32_0 = arith.constant 0 : i32
    %c0_i32_1 = arith.constant 0 : i32
    return %arg0, %c0_i32, %arg1, %arg2, %c0_i32_0 : i32, i32, i32, i32, i32
  }
  func.func @transform_1(%arg0: i32, %arg1: i32, %arg2: i32) -> (i32, i32, i32, i32, i32) {
    %c0_i32 = arith.constant 0 : i32
    %c0_i32_0 = arith.constant 0 : i32
    %c0_i32_1 = arith.constant 0 : i32
    return %arg0, %arg1, %c0_i32, %arg2, %c0_i32_0 : i32, i32, i32, i32, i32
  }
}

</mosaic_0001>

<bundles_post_ra>
// kernel: tpu_custom_call.1
= control target key start
LH: loop header
LB: loop body
LE: loop exit
PB: predicated region body
PF: predicated region fallthrough
CT: control target
= control target key end

     0   :  { %6 = vsyncpa [#allocation3], 0  ;;  %s679_s0 = inlined_call_operand.hbm [shape: f32[2,2,2,2,128], index: 0, kind: input, shape index: {}]   ;;  %s680_s1 = inlined_call_operand.hbm [shape: f32[2,2,2,2,128], index: 1, kind: output, shape index: {}]  }
   0x1   :  { %8 = vsyncpa [#allocation3 + $0x1], 0 }
   0x2   :  { %9 = vsyncpa [#allocation4], 0 }
   0x3   :  { %11 = vsyncpa [#allocation4 + $0x1], 0  ;;  %s504_s6 = smov 0   ;;  %s506_s7 = smov 0  }
   0x4   :  { %s508_s8 = smov 0   ;;  %s510_s9 = smov 0  }
   0x5   :  { %s512_s10 = smov 0   ;;  %s514_s11 = smov 0  }
   0x6 LB: > { %s287_s12 = sadd.s32 4294967295, %s486_s11   ;;  %s288_s13 = sadd.s32 4294967294, %s486_s11   ;;  %s486_s11 = sphi %s514_s11, %s17_s11   ;;  %s482_s10 = sphi %s512_s10, %s695_s10   ;;  %s478_s9 = sphi %s510_s9, %s694_s9   ;;  %s474_s8 = sphi %s508_s8, %s693_s8   ;;  %s470_s7 = sphi %s506_s7, %s692_s7   ;;  %s466_s6 = sphi %s504_s6, %s691_s6  }
   0x7   : > { %s36_s14 = sadd.s32 1, %s482_s10  ;;  %s47_s15 = sadd.s32 1, %s474_s8 }
   0x8   : > { %p38_p0 = scmp.ge.s32.totalorder %s36_s14, 2  ;;  %p54_p1 = scmp.ne.s32.totalorder %s474_s8, %s470_s7 }
   0x9   : > { %p55_p2 = scmp.eq.s32.totalorder %s486_s11, 0  ;;  %p60_p3 = scmp.ne.s32.totalorder %s470_s7, %s466_s6 }
   0xa   : > { %s697_s14 = smov (%p38_p0, %s36_s14), 0  ;;  %p61_p5 = scmp.eq.s32.totalorder %s287_s12, 0 }
   0xb   : > { %p545_p4 = por %p55_p2, %p54_p1  ;;  %s40_s17 = ssub.s32 %s482_s10, %s697_s14 }
   0xc   : > { %p88_p6 = scmp.eq.s32.totalorder %s287_s12, 1  ;;  %p45_p7 = scmp.eq.s32.totalorder %s40_s17, 0 }
   0xd   : > { %p551_p8 = por %p61_p5, %p60_p3  ;;  %p94_p10 = scmp.eq.s32.totalorder %s288_s13, 1 }
   0xe   : > { %p555_p9 = por %p88_p6, %p54_p1  ;;  %p320_p13 = scmp.lt.s32.totalorder %s486_s11, 2 }
   0xf   : > { %s560_s20 = scalar_select %p45_p7, %s474_s8, %s47_s15  }
  0x10   : > { %s684_s19 = scalar_select %p555_p9, 1, 0 }
  0x11   : > { %p562_p11 = por %p94_p10, %p60_p3  ;;  %s114_s22 = sand.u32 1, %s474_s8  }
  0x12   : > { %s291_s23 = sshll.u32 %s114_s22, 3  ;;  %s306_s24 = sshll.u32 %s482_s10, 7 }
  0x13   : > { %s685_s21 = scalar_select %p562_p11, 1, 0 }
  0x14   : > { %s573_s27 = scalar_lea.hbm %s679_s0, %s306_s24  ;;  %s118_s28 = scalar_lea.vmem [#allocation2], %s291_s23 }
  0x15   : > { %s128_s29 = sshll.u32 %s118_s28, 4  ;;  %p579_p0 = pnand %p320_p13, %p545_p4  ;;  %s575_s29 = int_to_ptr.vmem [resolvable:$true] %s128_s29 }
  0x16   : > { %s584_s2 = scalar_lea.sflag [#allocation3], %s114_s22  ;;  %s374_s3 = scalar_lea.hbm %s573_s27, 128 }
  0x17   : > { %p375_p2 = scmp.ne.s32.totalorder %s573_s27, %s374_s3  ;;  %p376_p3 = pneg %p579_p0 }
  0x18   : > { %s379_s12 = scalar_lea.hbm %s679_s0, 256  ;;  %p380_p4 = scmp.lt.u32.totalorder %s573_s27, %s679_s0 }
  0x19   : > { %p377_p5 = pnand %p376_p3, %p375_p2  ;;  %p381_p7 = scmp.lt.u32.totalorder %s379_s12, %s374_s3 }
  0x1a   : > { %p383_p13 = scmp.lt.u32.totalorder %s374_s3, %s573_s27 }
  0x1b   : > { %p378_p6 = pneg %p377_p5  ;;  %p382_p10 = por %p381_p7, %p380_p4 }
  0x1d   : > { %p384_p12 = por %p383_p13, %p382_p10 }
  0x1f   : > { %p385_p1 = pnand %p384_p12, %p378_p6 }
  0x21   : > { %388 = shalt.err (!%p385_p1)
}
  0x22   : > { %s389_s16 = scalar_lea.vmem %s575_s29, 128  ;;  %s488_s17 = smov [#allocation2]  }
  0x23   : > { %p390_p2 = scmp.ne.s32.totalorder %s575_s29, %s389_s16  ;;  %s394_s22 = sshll.u32 %s488_s17, 4  ;;  %s395_s22 = int_to_ptr.vmem [resolvable:$false] %s394_s22 }
  0x24   : > { %s396_s23 = scalar_lea.vmem %s395_s22, 256  ;;  %p397_p9 = scmp.lt.s32.totalorder %s575_s29, %s395_s22 }
  0x25   : > { %p392_p5 = pnand %p390_p2, %p376_p3  ;;  %p398_p4 = scmp.lt.s32.totalorder %s396_s23, %s389_s16 }
  0x27   : > { %p393_p11 = pneg %p392_p5  ;;  %p399_p7 = por %p398_p4, %p397_p9 }
  0x29   : > { %p400_p10 = pnand %p399_p7, %p393_p11 }
  0x2b   : > { %403 = shalt.err (!%p400_p10)
}
  0x2c   : > { %s489_s24 = smov 32   ;;  %s490_s25 = smov 2  }
  0x2d   : > { %315 = dma.hbm_to_vmem [thread:$0]  (!%p579_p0), %s573_s27, 128, %s575_s29, %s584_s2, %s489_s24, %s489_s24, %s490_s25  }
  0x2e   : > { %p136_p12 = scmp.lt.s32.totalorder %s486_s11, 3  ;;  %p687_p1 = scmp.ge.s32.totalorder %s486_s11, 1 }
  0x30   : > { %p137_p3 = pnand %p687_p1, %p136_p12 }
  0x31   : > { %s616_s26 = sand.u32 (!%p137_p3), 1, %s470_s7  }
  0x32   : > { %140 = sbr.rel (%p137_p3) target bundleno = 86 (0x56), region = 24  ;;  %s295_s28 = sshll.u32 (!%p137_p3), %s616_s26, 3 }
  0x33   : > { %s143_s3 = scalar_lea.sflag (!%p137_p3), [#allocation3], %s616_s26  ;;  %s146_s4 = scalar_lea.vmem (!%p137_p3), [#allocation2], %s295_s28 }
  0x39   : > { %457 = dma.done.wait (%p551_p8), %s143_s3, 128  }
  0x3a   : > { %459 = vsyncadd (%p551_p8), %s143_s3, 4294967168  ;;  %s164_s27 = scalar_lea.vmem [#allocation5], %s295_s28  ;;  %s307_s30 = sshll.u32 %s478_s9, 7  ;;  %v167_v0 = vld [vmem:[%s146_s4] sm:$0x3] }
  0x3b   : > { %s195_s29 = sshll.u32 %s164_s27, 4  ;;  %v168_v1 = vld [vmem:[%s146_s4 + $0x2] sm:$0x3]  ;;  %v297_v2 = vld [vmem:[%s146_s4 + $0x4] sm:$0x3]  ;;  %s630_s12 = scalar_lea.hbm %s680_s1, %s307_s30  ;;  %169 = vst [vmem:[%s164_s27] sm:$0x3] %v167_v0  ;;  %s625_s29 = int_to_ptr.vmem [resolvable:$true] %s195_s29 }
  0x3c   : > { %170 = vst [vmem:[%s164_s27 + $0x4] sm:$0x3] %v168_v1  ;;  %299 = vst [vmem:[%s164_s27 + $0x2] sm:$0x3] %v297_v2  ;;  %v298_v3 = vld [vmem:[%s146_s4 + $0x6] sm:$0x3] }
  0x3d   : > { %300 = vst [vmem:[%s164_s27 + $0x6] sm:$0x3] %v298_v3  ;;  %s178_s18 = scalar_lea.sflag [#allocation4], %s616_s26  ;;  %s404_s9 = scalar_lea.vmem %s625_s29, 128 }
  0x3e   : > { %p405_p8 = scmp.ne.s32.totalorder %s625_s29, %s404_s9  ;;  %p688_p9 = scmp.ne.s32.totalorder %s684_s19, 0 }
  0x3f   : > { %s491_s13 = smov [#allocation5]  }
  0x40   : > { %p406_p11 = pnand %p405_p8, %p688_p9  ;;  %s408_s15 = sshll.u32 %s491_s13, 4  ;;  %s409_s15 = int_to_ptr.vmem [resolvable:$false] %s408_s15 }
  0x41   : > { %s410_s16 = scalar_lea.vmem %s409_s15, 256  ;;  %p411_p6 = scmp.lt.s32.totalorder %s625_s29, %s409_s15 }
  0x42   : > { %p407_p0 = pneg %p406_p11  ;;  %p412_p13 = scmp.lt.s32.totalorder %s410_s16, %s404_s9 }
  0x44   : > { %p413_p2 = por %p412_p13, %p411_p6 }
  0x46   : > { %p414_p5 = pnand %p413_p2, %p407_p0 }
  0x48   : > { %417 = shalt.err (!%p414_p5)
}
  0x49   : > { %s418_s17 = scalar_lea.hbm %s630_s12, 128  ;;  %s422_s24 = scalar_lea.hbm %s680_s1, 256 }
  0x4a   : > { %p419_p4 = scmp.ne.s32.totalorder %s630_s12, %s418_s17  ;;  %p423_p12 = scmp.lt.u32.totalorder %s630_s12, %s680_s1 }
  0x4b   : > { %p424_p1 = scmp.lt.u32.totalorder %s422_s24, %s418_s17  ;;  %p426_p8 = scmp.lt.u32.totalorder %s418_s17, %s630_s12 }
  0x4c   : > { %p420_p7 = pnand %p419_p4, %p688_p9 }
  0x4d   : > { %p425_p3 = por %p424_p1, %p423_p12 }
  0x4e   : > { %p421_p10 = pneg %p420_p7 }
  0x4f   : > { %p427_p11 = por %p426_p8, %p425_p3 }
  0x51   : > { %p428_p0 = pnand %p427_p11, %p421_p10 }
  0x53   : > { %431 = shalt.err (!%p428_p0)
}
  0x54   : > { %s492_s3 = smov 32   ;;  %s493_s4 = smov 2  }
  0x55   : > { %310 = dma.vmem_to_hbm [thread:$0]  (%p688_p9), %s625_s29, 128, %s630_s12, %s178_s18, %s492_s3, %s492_s3, %s493_s4  }
  0x56 PF: > { %s210_s27 = sand.u32 1, %s466_s6   ;;  %p689_p6 = scmp.ne.s32.totalorder %s685_s21, 0 }
  0x57   : > { %p690_p13 = scmp.ge.s32.totalorder %s486_s11, 2  ;;  %s211_s30 = scalar_lea.sflag [#allocation4], %s210_s27 }
  0x59   : > { %p317_p2 = pnand %p690_p13, %p689_p6 }
  0x5b   : > { %461 = dma.done.wait (!%p317_p2), %s211_s30, 128  }
  0x5c   : > { %463 = vsyncadd (!%p317_p2), %s211_s30, 4294967168  ;;  %s17_s11 = sadd.s32 1, %s486_s11   ;;  %s691_s6 = smov %s470_s7 }
  0x5d   : > { %p14_p5 = scmp.ge.s32.totalorder %s17_s11, 4   ;;  %s692_s7 = smov %s474_s8 }
  0x5e   : > { %s693_s8 = smov %s560_s20  ;;  %s694_s9 = smov %s482_s10 }
  0x5f   : > { %s695_s10 = smov %s697_s14  ;;  %16 = sbr.rel (!%p14_p5) target bundleno = 6 (0x6), region = 71 }
  0x66   :  { %216 = vsyncpa [#allocation3], 1 }
  0x67   :  { %218 = vsyncpa [#allocation3 + $0x1], 1 }
  0x68   :  { %219 = vsyncpa [#allocation4], 1 }
  0x69   :  { %221 = vsyncpa [#allocation4 + $0x1], 1 }

</bundles_post_ra>
